<compile_context>
chip_gen: v7x
topology: tpu7x:2x2x1
jax: 0.10.0
libtpu: 0.0.40
codegen_flags: <defaults>
</compile_context>

<pallas_src>
import numpy as np
import jax
import jax.numpy as jnp
from jax.experimental import pallas as pl
from jax.experimental.pallas import tpu as pltpu

_GRAY_R, _GRAY_G, _GRAY_B = 0.2989, 0.587, 0.114
_SIXTH = 1.0 / 6.0
_TINY = 1e-20  # guards approx reciprocals against zero / denormal denominators


def _color_jitter_kernel(factors_ref, x_ref, o_ref):
    """Jitters a (tb, 3*HW) block: tb images, channels as static lane slices.

    factors_ref : SMEM (6,) f32 = [fb, fc, 1-fc, fs, 1-fs, fh]
    x_ref/o_ref : VMEM (tb, 3*HW)
    """
    hw = x_ref.shape[1] // 3
    fb = factors_ref[0]
    fc = factors_ref[1]
    omfc = factors_ref[2]
    fs = factors_ref[3]
    omfs = factors_ref[4]
    fh = factors_ref[5]

    # Lane-dense per-channel loads (hw % 128 == 0 keeps slices lane-aligned).
    r = x_ref[:, 0:hw].astype(jnp.float32)
    g = x_ref[:, hw:2 * hw].astype(jnp.float32)
    b = x_ref[:, 2 * hw:3 * hw].astype(jnp.float32)

    # ---- brightness: clamp(fb * img); input in [0, 1] and fb >= 0, so only
    # the upper clamp is needed.
    r = jnp.minimum(r * fb, 1.0)
    g = jnp.minimum(g * fb, 1.0)
    b = jnp.minimum(b * fb, 1.0)

    # ---- contrast: blend(img, mean(gray(img)), fc); mean is per image ------
    gray = _GRAY_R * r + _GRAY_G * g + _GRAY_B * b
    mean = jnp.mean(gray, axis=-1, keepdims=True)            # (tb, 1)
    cm = omfc * mean
    r = jnp.clip(fc * r + cm, 0.0, 1.0)
    g = jnp.clip(fc * g + cm, 0.0, 1.0)
    b = jnp.clip(fc * b + cm, 0.0, 1.0)

    # ---- saturation: blend(img, gray(img), fs) ------------------------------
    gray = omfs * (_GRAY_R * r + _GRAY_G * g + _GRAY_B * b)
    r = jnp.clip(fs * r + gray, 0.0, 1.0)
    g = jnp.clip(fs * g + gray, 0.0, 1.0)
    b = jnp.clip(fs * b + gray, 0.0, 1.0)

    # ---- hue: rgb -> (h, s, v), h = (h + fh) mod 1, (h, s, v) -> rgb --------
    maxc = jnp.maximum(jnp.maximum(r, g), b)
    minc = jnp.minimum(jnp.minimum(r, g), b)
    cr = maxc - minc

    # Two shared EUP reciprocals; eps-guarded so denormal/zero denominators
    # never overflow the approximate reciprocal into Inf/NaN.
    inv_maxc = pl.reciprocal(jnp.where(maxc < _TINY, 1.0, maxc), approx=True)
    inv_cr = pl.reciprocal(jnp.where(cr < _TINY, 1.0, cr), approx=True)
    sat = jnp.minimum(cr * inv_maxc, 1.0)

    rc = (maxc - r) * inv_cr
    gc = (maxc - g) * inv_cr
    bc = (maxc - b) * inv_cr

    max_is_r = maxc == r
    max_is_g = maxc == g
    h_num = jnp.where(max_is_r, bc - gc,
                      jnp.where(max_is_g, 2.0 + rc - bc, 4.0 + gc - rc))
    # Single fused modulo: rgb->hsv wraparound and the hue shift in one mod.
    h6 = jnp.mod(h_num * _SIXTH + 1.0 + fh, 1.0) * 6.0
    v = maxc
    vs = v * sat

    # Branchless hsv->rgb: f(n) = v - v*s*clip(min(k, 4-k), 0, 1),
    # k = (n + 6h) mod 6, (r, g, b) = (f(5), f(3), f(1)).  Continuous in h, so
    # no sector-select chain and no sector misclassification from the approx
    # reciprocals.
    def _chan(n):
        k = jnp.mod(h6 + n, 6.0)
        t = jnp.clip(jnp.minimum(k, 4.0 - k), 0.0, 1.0)
        return v - vs * t

    o_ref[:, 0:hw] = _chan(5.0).astype(o_ref.dtype)
    o_ref[:, hw:2 * hw] = _chan(3.0).astype(o_ref.dtype)
    o_ref[:, 2 * hw:3 * hw] = _chan(1.0).astype(o_ref.dtype)


def _choose_batch_tile(n, hw, max_block_bytes=4 * 1024 * 1024):
    """Rows (images) per (tb, 3*hw) f32 block.

    tb is a multiple of 8 (sublane tiling rule) or exactly n; sized to the
    block budget; keeps >= 2 grid steps when n > 8 so the "parallel" batch
    axis spans both v7x TensorCores.
    """
    row_bytes = 3 * hw * 4
    cap = max_block_bytes // max(row_bytes, 1)
    if n <= 8:
        return n                               # block dim == full dim: legal
    if cap < 8:
        # TODO(synk): single images this large need the two-pass spatially
        # tiled kernel (see module header); fall back to 8-row blocks.
        return 8
    tb = min((cap // 8) * 8, ((n + 7) // 8) * 8)
    half = ((n + 15) // 16) * 8                # ceil(n/2) rounded up to 8
    return max(8, min(tb, half))


@jax.jit
def _color_jitter_pallas(x, factors):
    n, c, h, w = x.shape
    assert c == 3, "ColorJitter hue/saturation requires 3-channel RGB input"
    hw = h * w
    flat = c * hw
    xr = x.reshape(n, flat)                    # lane-dense, sublane = batch
    tb = _choose_batch_tile(n, hw)
    itemsize = jnp.dtype(x.dtype).itemsize
    block_bytes = tb * flat * itemsize
    # 2 input + 2 output double buffers + headroom; capped for v7x 64 MiB VMEM.
    vmem_limit = int(min(max(4 * block_bytes + 4 * 1024 * 1024,
                             16 * 1024 * 1024),
                         48 * 1024 * 1024))
    out = pl.pallas_call(
        _color_jitter_kernel,
        out_shape=jax.ShapeDtypeStruct((n, flat), x.dtype),
        grid=(pl.cdiv(n, tb),),
        in_specs=[
            pl.BlockSpec(memory_space=pltpu.MemorySpace.SMEM),   # factors (6,)
            pl.BlockSpec((tb, flat), lambda i: (i, 0)),
        ],
        out_specs=pl.BlockSpec((tb, flat), lambda i: (i, 0)),
        compiler_params=pltpu.CompilerParams(
            dimension_semantics=("parallel",),
            vmem_limit_bytes=vmem_limit),
    )(factors, xr)
    return out.reshape(n, c, h, w)


class ImgColorJitterAug:
    """JAX/Pallas port of ImgColorJitterAug (NCHW float RGB images in [0, 1])."""

    def __init__(self, input_shape, brightness=0.3, contrast=0.3,
                 saturation=0.3, hue=0.3, epsilon=0.05):
        self.brightness = brightness
        self.contrast = contrast
        self.saturation = saturation
        self.hue = hue
        self.epsilon = epsilon
        self.training = True

    def forward(self, x, key):
        # Host-side gate, identical in spirit to np.random.rand() in the
        # reference module; no device->host transfer / dispatch stall.
        if self.training and float(np.random.rand()) > self.epsilon:
            kb, kc, ks, kh = jax.random.split(key, 4)
            fb = jax.random.uniform(kb, (), minval=1.0 - self.brightness,
                                    maxval=1.0 + self.brightness)
            fc = jax.random.uniform(kc, (), minval=1.0 - self.contrast,
                                    maxval=1.0 + self.contrast)
            fs = jax.random.uniform(ks, (), minval=1.0 - self.saturation,
                                    maxval=1.0 + self.saturation)
            fh = jax.random.uniform(kh, (), minval=-self.hue, maxval=self.hue)
            factors = jnp.stack([fb, fc, 1.0 - fc, fs, 1.0 - fs, fh]).astype(
                jnp.float32)
            return _color_jitter_pallas(x, factors)
        return x

    def output_shape(self, input_shape):
        return input_shape


if __name__ == "__main__":
    np.random.seed(0)            # gate: rand() = 0.548... > epsilon -> jitter path
    key = jax.random.PRNGKey(0)
    k_img, k_fwd = jax.random.split(key)

    N, C, H, W = 2, 3, 16, 16
    x = jax.random.uniform(k_img, (N, C, H, W), dtype=jnp.float32)  # in [0, 1]

    # 1) Identity factors: jitter(1, 1, 1, 0) should reproduce the input closely
    #    (hue still does a full RGB->HSV->RGB round trip in the kernel).
    ident_factors = jnp.array([1.0, 1.0, 0.0, 1.0, 0.0, 0.0], jnp.float32)
    ident = _color_jitter_pallas(x, ident_factors)
    ident = jax.block_until_ready(ident)
    assert ident.shape == x.shape and ident.dtype == x.dtype
    assert bool(jnp.all(jnp.abs(ident - x) < 5e-2))

    # 2) Full forward path (takes the jitter branch given the seeded gate).
    aug = ImgColorJitterAug(input_shape=(C, H, W))
    out = aug.forward(x, k_fwd)
    out = jax.block_until_ready(out)

    assert out.shape == x.shape and out.dtype == x.dtype
    assert bool(jnp.all(jnp.isfinite(out)))
    assert bool(jnp.all((out >= 0.0) & (out <= 1.0)))
    print("KERNEL_OK")
</pallas_src>

<mosaic_0001>
module attributes {stable_mosaic.version = 11 : i64} {
  func.func @_color_jitter_kernel(%arg0: i32, %arg1: memref<6xf32, #tpu.memory_space<smem>>, %arg2: memref<2x768xf32, #tpu.memory_space<vmem>>, %arg3: memref<2x768xf32, #tpu.memory_space<vmem>>) attributes {dimension_semantics = [#tpu.dimension_semantics<parallel>], iteration_bounds = array<i64: 1>, scalar_prefetch = 0 : i64, scratch_operands = 0 : i64, tpu.core_type = #tpu.core_type<tc>, window_params = [{transform_indices = @transform_0, window_bounds = array<i64: 6>}, {transform_indices = @transform_1, window_bounds = array<i64: 2, 768>}, {transform_indices = @transform_2, window_bounds = array<i64: 2, 768>}]} {
    %c0 = arith.constant 0 : index
    %0 = memref.load %arg1[%c0] : memref<6xf32, #tpu.memory_space<smem>>
    %c1 = arith.constant 1 : index
    %1 = memref.load %arg1[%c1] : memref<6xf32, #tpu.memory_space<smem>>
    %c2 = arith.constant 2 : index
    %2 = memref.load %arg1[%c2] : memref<6xf32, #tpu.memory_space<smem>>
    %c3 = arith.constant 3 : index
    %3 = memref.load %arg1[%c3] : memref<6xf32, #tpu.memory_space<smem>>
    %c4 = arith.constant 4 : index
    %4 = memref.load %arg1[%c4] : memref<6xf32, #tpu.memory_space<smem>>
    %c5 = arith.constant 5 : index
    %5 = memref.load %arg1[%c5] : memref<6xf32, #tpu.memory_space<smem>>
    %c0_0 = arith.constant 0 : index
    %c0_1 = arith.constant 0 : index
    %6 = vector.load %arg2[%c0_0, %c0_1] : memref<2x768xf32, #tpu.memory_space<vmem>>, vector<2x256xf32>
    %c0_2 = arith.constant 0 : index
    %c256 = arith.constant 256 : index
    %7 = vector.load %arg2[%c0_2, %c256] : memref<2x768xf32, #tpu.memory_space<vmem>>, vector<2x256xf32>
    %c0_3 = arith.constant 0 : index
    %c512 = arith.constant 512 : index
    %8 = vector.load %arg2[%c0_3, %c512] : memref<2x768xf32, #tpu.memory_space<vmem>>, vector<2x256xf32>
    %9 = vector.broadcast %0 : f32 to vector<2x256xf32>
    %10 = arith.mulf %6, %9 : vector<2x256xf32>
    %cst = arith.constant 1.000000e+00 : f32
    %11 = vector.broadcast %cst : f32 to vector<2x256xf32>
    %12 = arith.minimumf %10, %11 : vector<2x256xf32>
    %13 = vector.broadcast %0 : f32 to vector<2x256xf32>
    %14 = arith.mulf %7, %13 : vector<2x256xf32>
    %cst_4 = arith.constant 1.000000e+00 : f32
    %15 = vector.broadcast %cst_4 : f32 to vector<2x256xf32>
    %16 = arith.minimumf %14, %15 : vector<2x256xf32>
    %17 = vector.broadcast %0 : f32 to vector<2x256xf32>
    %18 = arith.mulf %8, %17 : vector<2x256xf32>
    %cst_5 = arith.constant 1.000000e+00 : f32
    %19 = vector.broadcast %cst_5 : f32 to vector<2x256xf32>
    %20 = arith.minimumf %18, %19 : vector<2x256xf32>
    %cst_6 = arith.constant 2.989000e-01 : f32
    %21 = vector.broadcast %cst_6 : f32 to vector<2x256xf32>
    %22 = arith.mulf %21, %12 : vector<2x256xf32>
    %cst_7 = arith.constant 5.870000e-01 : f32
    %23 = vector.broadcast %cst_7 : f32 to vector<2x256xf32>
    %24 = arith.mulf %23, %16 : vector<2x256xf32>
    %25 = arith.addf %22, %24 : vector<2x256xf32>
    %cst_8 = arith.constant 1.140000e-01 : f32
    %26 = vector.broadcast %cst_8 : f32 to vector<2x256xf32>
    %27 = arith.mulf %26, %20 : vector<2x256xf32>
    %28 = arith.addf %25, %27 : vector<2x256xf32>
    %cst_9 = arith.constant dense<0.000000e+00> : vector<2xf32>
    %29 = vector.multi_reduction <add>, %28, %cst_9 [1] : vector<2x256xf32> to vector<2xf32>
    %30 = vector.shape_cast %29 : vector<2xf32> to vector<2x1xf32>
    %cst_10 = arith.constant 2.560000e+02 : f32
    %31 = vector.broadcast %cst_10 : f32 to vector<2x1xf32>
    %32 = arith.divf %30, %31 : vector<2x1xf32>
    %33 = vector.broadcast %2 : f32 to vector<2x1xf32>
    %34 = arith.mulf %33, %32 : vector<2x1xf32>
    %35 = vector.broadcast %1 : f32 to vector<2x256xf32>
    %36 = arith.mulf %35, %12 : vector<2x256xf32>
    %37 = vector.broadcast %34 : vector<2x1xf32> to vector<2x256xf32>
    %38 = arith.addf %36, %37 : vector<2x256xf32>
    %cst_11 = arith.constant 0.000000e+00 : f32
    %cst_12 = arith.constant 1.000000e+00 : f32
    %39 = vector.broadcast %cst_11 : f32 to vector<2x256xf32>
    %40 = arith.maximumf %39, %38 : vector<2x256xf32>
    %41 = vector.broadcast %cst_12 : f32 to vector<2x256xf32>
    %42 = arith.minimumf %41, %40 : vector<2x256xf32>
    %43 = vector.broadcast %1 : f32 to vector<2x256xf32>
    %44 = arith.mulf %43, %16 : vector<2x256xf32>
    %45 = vector.broadcast %34 : vector<2x1xf32> to vector<2x256xf32>
    %46 = arith.addf %44, %45 : vector<2x256xf32>
    %cst_13 = arith.constant 0.000000e+00 : f32
    %cst_14 = arith.constant 1.000000e+00 : f32
    %47 = vector.broadcast %cst_13 : f32 to vector<2x256xf32>
    %48 = arith.maximumf %47, %46 : vector<2x256xf32>
    %49 = vector.broadcast %cst_14 : f32 to vector<2x256xf32>
    %50 = arith.minimumf %49, %48 : vector<2x256xf32>
    %51 = vector.broadcast %1 : f32 to vector<2x256xf32>
    %52 = arith.mulf %51, %20 : vector<2x256xf32>
    %53 = vector.broadcast %34 : vector<2x1xf32> to vector<2x256xf32>
    %54 = arith.addf %52, %53 : vector<2x256xf32>
    %cst_15 = arith.constant 0.000000e+00 : f32
    %cst_16 = arith.constant 1.000000e+00 : f32
    %55 = vector.broadcast %cst_15 : f32 to vector<2x256xf32>
    %56 = arith.maximumf %55, %54 : vector<2x256xf32>
    %57 = vector.broadcast %cst_16 : f32 to vector<2x256xf32>
    %58 = arith.minimumf %57, %56 : vector<2x256xf32>
    %cst_17 = arith.constant 2.989000e-01 : f32
    %59 = vector.broadcast %cst_17 : f32 to vector<2x256xf32>
    %60 = arith.mulf %59, %42 : vector<2x256xf32>
    %cst_18 = arith.constant 5.870000e-01 : f32
    %61 = vector.broadcast %cst_18 : f32 to vector<2x256xf32>
    %62 = arith.mulf %61, %50 : vector<2x256xf32>
    %63 = arith.addf %60, %62 : vector<2x256xf32>
    %cst_19 = arith.constant 1.140000e-01 : f32
    %64 = vector.broadcast %cst_19 : f32 to vector<2x256xf32>
    %65 = arith.mulf %64, %58 : vector<2x256xf32>
    %66 = arith.addf %63, %65 : vector<2x256xf32>
    %67 = vector.broadcast %4 : f32 to vector<2x256xf32>
    %68 = arith.mulf %67, %66 : vector<2x256xf32>
    %69 = vector.broadcast %3 : f32 to vector<2x256xf32>
    %70 = arith.mulf %69, %42 : vector<2x256xf32>
    %71 = arith.addf %70, %68 : vector<2x256xf32>
    %cst_20 = arith.constant 0.000000e+00 : f32
    %cst_21 = arith.constant 1.000000e+00 : f32
    %72 = vector.broadcast %cst_20 : f32 to vector<2x256xf32>
    %73 = arith.maximumf %72, %71 : vector<2x256xf32>
    %74 = vector.broadcast %cst_21 : f32 to vector<2x256xf32>
    %75 = arith.minimumf %74, %73 : vector<2x256xf32>
    %76 = vector.broadcast %3 : f32 to vector<2x256xf32>
    %77 = arith.mulf %76, %50 : vector<2x256xf32>
    %78 = arith.addf %77, %68 : vector<2x256xf32>
    %cst_22 = arith.constant 0.000000e+00 : f32
    %cst_23 = arith.constant 1.000000e+00 : f32
    %79 = vector.broadcast %cst_22 : f32 to vector<2x256xf32>
    %80 = arith.maximumf %79, %78 : vector<2x256xf32>
    %81 = vector.broadcast %cst_23 : f32 to vector<2x256xf32>
    %82 = arith.minimumf %81, %80 : vector<2x256xf32>
    %83 = vector.broadcast %3 : f32 to vector<2x256xf32>
    %84 = arith.mulf %83, %58 : vector<2x256xf32>
    %85 = arith.addf %84, %68 : vector<2x256xf32>
    %cst_24 = arith.constant 0.000000e+00 : f32
    %cst_25 = arith.constant 1.000000e+00 : f32
    %86 = vector.broadcast %cst_24 : f32 to vector<2x256xf32>
    %87 = arith.maximumf %86, %85 : vector<2x256xf32>
    %88 = vector.broadcast %cst_25 : f32 to vector<2x256xf32>
    %89 = arith.minimumf %88, %87 : vector<2x256xf32>
    %90 = arith.maximumf %75, %82 : vector<2x256xf32>
    %91 = arith.maximumf %90, %89 : vector<2x256xf32>
    %92 = arith.minimumf %75, %82 : vector<2x256xf32>
    %93 = arith.minimumf %92, %89 : vector<2x256xf32>
    %94 = arith.subf %91, %93 : vector<2x256xf32>
    %cst_26 = arith.constant 9.99999968E-21 : f32
    %95 = vector.broadcast %cst_26 : f32 to vector<2x256xf32>
    %96 = arith.cmpf olt, %91, %95 : vector<2x256xf32>
    %cst_27 = arith.constant 1.000000e+00 : f32
    %97 = vector.broadcast %cst_27 : f32 to vector<2x256xf32>
    %98 = arith.select %96, %97, %91 : vector<2x256xi1>, vector<2x256xf32>
    %99 = tpu.reciprocal %98 {approx = true} : vector<2x256xf32> -> vector<2x256xf32>
    %cst_28 = arith.constant 9.99999968E-21 : f32
    %100 = vector.broadcast %cst_28 : f32 to vector<2x256xf32>
    %101 = arith.cmpf olt, %94, %100 : vector<2x256xf32>
    %cst_29 = arith.constant 1.000000e+00 : f32
    %102 = vector.broadcast %cst_29 : f32 to vector<2x256xf32>
    %103 = arith.select %101, %102, %94 : vector<2x256xi1>, vector<2x256xf32>
    %104 = tpu.reciprocal %103 {approx = true} : vector<2x256xf32> -> vector<2x256xf32>
    %105 = arith.mulf %94, %99 : vector<2x256xf32>
    %cst_30 = arith.constant 1.000000e+00 : f32
    %106 = vector.broadcast %cst_30 : f32 to vector<2x256xf32>
    %107 = arith.minimumf %105, %106 : vector<2x256xf32>
    %108 = arith.subf %91, %75 : vector<2x256xf32>
    %109 = arith.mulf %108, %104 : vector<2x256xf32>
    %110 = arith.subf %91, %82 : vector<2x256xf32>
    %111 = arith.mulf %110, %104 : vector<2x256xf32>
    %112 = arith.subf %91, %89 : vector<2x256xf32>
    %113 = arith.mulf %112, %104 : vector<2x256xf32>
    %114 = arith.cmpf oeq, %91, %75 : vector<2x256xf32>
    %115 = arith.cmpf oeq, %91, %82 : vector<2x256xf32>
    %116 = arith.subf %113, %111 : vector<2x256xf32>
    %cst_31 = arith.constant 2.000000e+00 : f32
    %117 = vector.broadcast %cst_31 : f32 to vector<2x256xf32>
    %118 = arith.addf %117, %109 : vector<2x256xf32>
    %119 = arith.subf %118, %113 : vector<2x256xf32>
    %cst_32 = arith.constant 4.000000e+00 : f32
    %120 = vector.broadcast %cst_32 : f32 to vector<2x256xf32>
    %121 = arith.addf %120, %111 : vector<2x256xf32>
    %122 = arith.subf %121, %109 : vector<2x256xf32>
    %123 = arith.select %115, %119, %122 : vector<2x256xi1>, vector<2x256xf32>
    %124 = arith.select %114, %116, %123 : vector<2x256xi1>, vector<2x256xf32>
    %cst_33 = arith.constant 0.166666672 : f32
    %125 = vector.broadcast %cst_33 : f32 to vector<2x256xf32>
    %126 = arith.mulf %124, %125 : vector<2x256xf32>
    %cst_34 = arith.constant 1.000000e+00 : f32
    %127 = vector.broadcast %cst_34 : f32 to vector<2x256xf32>
    %128 = arith.addf %126, %127 : vector<2x256xf32>
    %129 = vector.broadcast %5 : f32 to vector<2x256xf32>
    %130 = arith.addf %128, %129 : vector<2x256xf32>
    %cst_35 = arith.constant 1.000000e+00 : f32
    %131 = vector.broadcast %cst_35 : f32 to vector<2x256xf32>
    %132 = arith.remf %130, %131 : vector<2x256xf32>
    %cst_36 = arith.constant 0.000000e+00 : f32
    %133 = vector.broadcast %cst_36 : f32 to vector<2x256xf32>
    %134 = arith.cmpf one, %132, %133 : vector<2x256xf32>
    %cst_37 = arith.constant 0.000000e+00 : f32
    %135 = vector.broadcast %cst_37 : f32 to vector<2x256xf32>
    %136 = arith.cmpf olt, %132, %135 : vector<2x256xf32>
    %cst_38 = arith.constant 0.000000e+00 : f32
    %137 = arith.cmpf olt, %cst_35, %cst_38 : f32
    %138 = vector.broadcast %137 : i1 to vector<2x256xi1>
    %139 = vector.broadcast %138 : vector<2x256xi1> to vector<2x256xi1>
    %140 = arith.xori %136, %139 : vector<2x256xi1>
    %141 = arith.andi %140, %134 : vector<2x256xi1>
    %142 = vector.broadcast %cst_35 : f32 to vector<2x256xf32>
    %143 = arith.addf %132, %142 : vector<2x256xf32>
    %144 = arith.select %141, %143, %132 : vector<2x256xi1>, vector<2x256xf32>
    %cst_39 = arith.constant 6.000000e+00 : f32
    %145 = vector.broadcast %cst_39 : f32 to vector<2x256xf32>
    %146 = arith.mulf %144, %145 : vector<2x256xf32>
    %147 = arith.mulf %91, %107 : vector<2x256xf32>
    %cst_40 = arith.constant 5.000000e+00 : f32
    %148 = vector.broadcast %cst_40 : f32 to vector<2x256xf32>
    %149 = arith.addf %146, %148 : vector<2x256xf32>
    %cst_41 = arith.constant 6.000000e+00 : f32
    %150 = vector.broadcast %cst_41 : f32 to vector<2x256xf32>
    %151 = arith.remf %149, %150 : vector<2x256xf32>
    %cst_42 = arith.constant 0.000000e+00 : f32
    %152 = vector.broadcast %cst_42 : f32 to vector<2x256xf32>
    %153 = arith.cmpf one, %151, %152 : vector<2x256xf32>
    %cst_43 = arith.constant 0.000000e+00 : f32
    %154 = vector.broadcast %cst_43 : f32 to vector<2x256xf32>
    %155 = arith.cmpf olt, %151, %154 : vector<2x256xf32>
    %cst_44 = arith.constant 0.000000e+00 : f32
    %156 = arith.cmpf olt, %cst_41, %cst_44 : f32
    %157 = vector.broadcast %156 : i1 to vector<2x256xi1>
    %158 = vector.broadcast %157 : vector<2x256xi1> to vector<2x256xi1>
    %159 = arith.xori %155, %158 : vector<2x256xi1>
    %160 = arith.andi %159, %153 : vector<2x256xi1>
    %161 = vector.broadcast %cst_41 : f32 to vector<2x256xf32>
    %162 = arith.addf %151, %161 : vector<2x256xf32>
    %163 = arith.select %160, %162, %151 : vector<2x256xi1>, vector<2x256xf32>
    %cst_45 = arith.constant 4.000000e+00 : f32
    %164 = vector.broadcast %cst_45 : f32 to vector<2x256xf32>
    %165 = arith.subf %164, %163 : vector<2x256xf32>
    %166 = arith.minimumf %163, %165 : vector<2x256xf32>
    %cst_46 = arith.constant 0.000000e+00 : f32
    %cst_47 = arith.constant 1.000000e+00 : f32
    %167 = vector.broadcast %cst_46 : f32 to vector<2x256xf32>
    %168 = arith.maximumf %167, %166 : vector<2x256xf32>
    %169 = vector.broadcast %cst_47 : f32 to vector<2x256xf32>
    %170 = arith.minimumf %169, %168 : vector<2x256xf32>
    %171 = arith.mulf %147, %170 : vector<2x256xf32>
    %172 = arith.subf %91, %171 : vector<2x256xf32>
    %c0_48 = arith.constant 0 : index
    %c0_49 = arith.constant 0 : index
    %173 = vector.load %arg3[%c0_48, %c0_49] : memref<2x768xf32, #tpu.memory_space<vmem>>, vector<2x256xf32>
    tpu.vector_store %arg3[%c0_48, %c0_49], %172 {strides = array<i32>} : memref<2x768xf32, #tpu.memory_space<vmem>>, vector<2x256xf32>,
    %cst_50 = arith.constant 3.000000e+00 : f32
    %174 = vector.broadcast %cst_50 : f32 to vector<2x256xf32>
    %175 = arith.addf %146, %174 : vector<2x256xf32>
    %cst_51 = arith.constant 6.000000e+00 : f32
    %176 = vector.broadcast %cst_51 : f32 to vector<2x256xf32>
    %177 = arith.remf %175, %176 : vector<2x256xf32>
    %cst_52 = arith.constant 0.000000e+00 : f32
    %178 = vector.broadcast %cst_52 : f32 to vector<2x256xf32>
    %179 = arith.cmpf one, %177, %178 : vector<2x256xf32>
    %cst_53 = arith.constant 0.000000e+00 : f32
    %180 = vector.broadcast %cst_53 : f32 to vector<2x256xf32>
    %181 = arith.cmpf olt, %177, %180 : vector<2x256xf32>
    %cst_54 = arith.constant 0.000000e+00 : f32
    %182 = arith.cmpf olt, %cst_51, %cst_54 : f32
    %183 = vector.broadcast %182 : i1 to vector<2x256xi1>
    %184 = vector.broadcast %183 : vector<2x256xi1> to vector<2x256xi1>
    %185 = arith.xori %181, %184 : vector<2x256xi1>
    %186 = arith.andi %185, %179 : vector<2x256xi1>
    %187 = vector.broadcast %cst_51 : f32 to vector<2x256xf32>
    %188 = arith.addf %177, %187 : vector<2x256xf32>
    %189 = arith.select %186, %188, %177 : vector<2x256xi1>, vector<2x256xf32>
    %cst_55 = arith.constant 4.000000e+00 : f32
    %190 = vector.broadcast %cst_55 : f32 to vector<2x256xf32>
    %191 = arith.subf %190, %189 : vector<2x256xf32>
    %192 = arith.minimumf %189, %191 : vector<2x256xf32>
    %cst_56 = arith.constant 0.000000e+00 : f32
    %cst_57 = arith.constant 1.000000e+00 : f32
    %193 = vector.broadcast %cst_56 : f32 to vector<2x256xf32>
    %194 = arith.maximumf %193, %192 : vector<2x256xf32>
    %195 = vector.broadcast %cst_57 : f32 to vector<2x256xf32>
    %196 = arith.minimumf %195, %194 : vector<2x256xf32>
    %197 = arith.mulf %147, %196 : vector<2x256xf32>
    %198 = arith.subf %91, %197 : vector<2x256xf32>
    %c0_58 = arith.constant 0 : index
    %c256_59 = arith.constant 256 : index
    %199 = vector.load %arg3[%c0_58, %c256_59] : memref<2x768xf32, #tpu.memory_space<vmem>>, vector<2x256xf32>
    tpu.vector_store %arg3[%c0_58, %c256_59], %198 {strides = array<i32>} : memref<2x768xf32, #tpu.memory_space<vmem>>, vector<2x256xf32>,
    %cst_60 = arith.constant 1.000000e+00 : f32
    %200 = vector.broadcast %cst_60 : f32 to vector<2x256xf32>
    %201 = arith.addf %146, %200 : vector<2x256xf32>
    %cst_61 = arith.constant 6.000000e+00 : f32
    %202 = vector.broadcast %cst_61 : f32 to vector<2x256xf32>
    %203 = arith.remf %201, %202 : vector<2x256xf32>
    %cst_62 = arith.constant 0.000000e+00 : f32
    %204 = vector.broadcast %cst_62 : f32 to vector<2x256xf32>
    %205 = arith.cmpf one, %203, %204 : vector<2x256xf32>
    %cst_63 = arith.constant 0.000000e+00 : f32
    %206 = vector.broadcast %cst_63 : f32 to vector<2x256xf32>
    %207 = arith.cmpf olt, %203, %206 : vector<2x256xf32>
    %cst_64 = arith.constant 0.000000e+00 : f32
    %208 = arith.cmpf olt, %cst_61, %cst_64 : f32
    %209 = vector.broadcast %208 : i1 to vector<2x256xi1>
    %210 = vector.broadcast %209 : vector<2x256xi1> to vector<2x256xi1>
    %211 = arith.xori %207, %210 : vector<2x256xi1>
    %212 = arith.andi %211, %205 : vector<2x256xi1>
    %213 = vector.broadcast %cst_61 : f32 to vector<2x256xf32>
    %214 = arith.addf %203, %213 : vector<2x256xf32>
    %215 = arith.select %212, %214, %203 : vector<2x256xi1>, vector<2x256xf32>
    %cst_65 = arith.constant 4.000000e+00 : f32
    %216 = vector.broadcast %cst_65 : f32 to vector<2x256xf32>
    %217 = arith.subf %216, %215 : vector<2x256xf32>
    %218 = arith.minimumf %215, %217 : vector<2x256xf32>
    %cst_66 = arith.constant 0.000000e+00 : f32
    %cst_67 = arith.constant 1.000000e+00 : f32
    %219 = vector.broadcast %cst_66 : f32 to vector<2x256xf32>
    %220 = arith.maximumf %219, %218 : vector<2x256xf32>
    %221 = vector.broadcast %cst_67 : f32 to vector<2x256xf32>
    %222 = arith.minimumf %221, %220 : vector<2x256xf32>
    %223 = arith.mulf %147, %222 : vector<2x256xf32>
    %224 = arith.subf %91, %223 : vector<2x256xf32>
    %c0_68 = arith.constant 0 : index
    %c512_69 = arith.constant 512 : index
    %225 = vector.load %arg3[%c0_68, %c512_69] : memref<2x768xf32, #tpu.memory_space<vmem>>, vector<2x256xf32>
    tpu.vector_store %arg3[%c0_68, %c512_69], %224 {strides = array<i32>} : memref<2x768xf32, #tpu.memory_space<vmem>>, vector<2x256xf32>,
    return
  }
  func.func @transform_0(%arg0: i32) -> i32 {
    %c0_i32 = arith.constant 0 : i32
    %c0_i32_0 = arith.constant 0 : i32
    return %c0_i32 : i32
  }
  func.func @transform_1(%arg0: i32) -> (i32, i32) {
    %c0_i32 = arith.constant 0 : i32
    %c0_i32_0 = arith.constant 0 : i32
    return %arg0, %c0_i32 : i32, i32
  }
  func.func @transform_2(%arg0: i32) -> (i32, i32) {
    %c0_i32 = arith.constant 0 : i32
    %c0_i32_0 = arith.constant 0 : i32
    return %arg0, %c0_i32 : i32, i32
  }
}

</mosaic_0001>

<bundles_post_ra>
// kernel: _color_jitter_pallas.1
= control target key start
LH: loop header
LB: loop body
LE: loop exit
PB: predicated region body
PF: predicated region fallthrough
CT: control target
= control target key end

     0   :  { %7 = vsyncpa [#allocation3], 0  ;;  %s318_s0 = inlined_call_operand.vmem [shape: f32[6], index: 0, kind: input, shape index: {}]   ;;  %s319_s1 = inlined_call_operand.vmem [shape: f32[2,768], index: 1, kind: input, shape index: {}]   ;;  %s320_s2 = inlined_call_operand.vmem [shape: f32[2,768], index: 2, kind: output, shape index: {}]  }
   0x1   :  { %s14_s11 = sshll.u32 %s318_s0, 4  ;;  %s15_s11 = int_to_ptr.vmem [resolvable:$true] %s14_s11 }
   0x2   :  { %s246_s12 = scalar_lea.vmem %s15_s11, 16  ;;  %p251_p1 = scmp.lt.s32.totalorder %s15_s11, %s15_s11 }
   0x3   :  { %p247_p0 = scmp.ne.s32.totalorder %s15_s11, %s246_s12  ;;  %p252_p2 = scmp.lt.s32.totalorder %s246_s12, %s246_s12 }
   0x5   :  { %p253_p3 = por %p252_p2, %p251_p1 }
   0x7   :  { %p254_p4 = pnand %p253_p3, %p247_p0 }
   0x9   :  { %257 = shalt.err (!%p254_p4)
}
   0xa   :  { %s260_s13 = smov [#allocation2]  }
   0xb   :  { %17 = dma.vmem_to_smem %s15_s11, 16, %s260_s13, [#allocation3]  }
   0xc   :  { %258 = dma.done.wait [#allocation3], 16  }
   0xd   :  { %259 = vsyncadd [#allocation3], 4294967280 }
   0xe   :  { %23 = sfence }
   0xf   :  { %s24_s14 = sld [smem:[#allocation2]]  ;;  %v30_v0 = vld [vmem:[%s319_s1] sm:$0xf]  ;;  %v31_v1 = vld [vmem:[%s319_s1 + $0x4] sm:$0xf]  ;;  %v49_v3 = vlaneseq  ;;  %vm56_vm0 = vcmask 1041408  }
  0x10   :  { %v32_v2 = vld [vmem:[%s319_s1 + $0x8] sm:$0xf]  ;;  %v261_v4 = vmov 1983009808   ;;  %s234_s1 = sld [smem:[#allocation2 + $0x1]]  ;;  %s235_s20 = sld [smem:[#allocation2 + $0x2]] }
  0x11   :  { %v47_v5 = vunpack.c.l.s4 %v261_v4  ;;  %v50_v10 = vshrl.u32 %v49_v3, 7  ;;  %v262_v26 = vmov 269488144   ;;  %s236_s21 = sld [smem:[#allocation2 + $0x3]]  ;;  %s237_s22 = sld [smem:[#allocation2 + $0x4]] }
  0x12   :  { %v70_v27 = vunpack.c.l.s4 %v262_v26  ;;  %s238_s23 = sld [smem:[#allocation2 + $0x5]] }
  0x13   :  { %v48_v14 = vunpack.c.0.s8 %v47_v5 }
  0x14   :  { %v71_v28 = vunpack.c.0.s8 %v70_v27 }
  0x15   :  { %v33_v6 = vstv %s24_s14  ;;  %v51_v19 = vsub.s32 %v48_v14, %v50_v10 }
  0x16   :  { %v34_v7 = vmul.f32 %v33_v6, %v30_v0  ;;  %v36_v8 = vmul.f32 %v33_v6, %v31_v1  ;;  %v38_v9 = vmul.f32 %v33_v6, %v32_v2  ;;  %v64_v30 = vstv %s235_s20 }
  0x17   :  { %v66_v31 = vstv %s234_s1  ;;  %v74_v33 = vsub.s32 %v71_v28, %v50_v10  ;;  %v93_v52 = vstv %s237_s22  ;;  %v95_v53 = vstv %s236_s21 }
  0x18   :  { %v35_v11 = vmin.f32 %v34_v7, 1.0  ;;  %v37_v12 = vmin.f32 %v36_v8, 1.0  ;;  %v39_v13 = vmin.f32 %v38_v9, 1.0 }
  0x1a   :  { %v40_v15 = vmul.f32 0.2989, %v35_v11  ;;  %v41_v16 = vmul.f32 0.587, %v37_v12  ;;  %v43_v17 = vmul.f32 0.114, %v39_v13  ;;  %v67_v35 = vmul.f32 %v66_v31, %v35_v11 }
  0x1b   :  { %v80_v36 = vmul.f32 %v66_v31, %v37_v12  ;;  %v84_v37 = vmul.f32 %v66_v31, %v39_v13 }
  0x1c   :  { %v42_v18 = vadd.f32 %v41_v16, %v40_v15 }
  0x1e   :  { %v44_v20 = vadd.f32 %v43_v17, %v42_v18 }
  0x20   :  { %v52_v21 = vrot.slane %v44_v20, %v51_v19 }
  0x22   :  { %v53_v22 = vcombine.high %v52_v21, %v52_v21  ;;  %v57_v23 = vsel %vm56_vm0, %v52_v21, 0.0 }
  0x24   :  { %v58_v24 = vsel %vm56_vm0, %v53_v22, 0.0 }
  0x25   :  { %v59_v25 = vadd.f32 %v58_v24, %v57_v23 }
  0x27   :  { %60 = vadd.xlane.f32.xlu0 %v59_v25  ;;  %v138_v25 = vstv %s238_s23 }
  0xb4   :  { %v61_v29 = vpop.xlane.xlu0 %60 }
  0xb5   :  { %v63_v32 = vmul.f32 0.00390625, %v61_v29 }
  0xb7   :  { %v65_v34 = vmul.f32 %v64_v30, %v63_v32 }
  0xb9   :  { %v75_v38 = vrot.slane %v65_v34, %v74_v33 }
  0xbb   :  { %v77_v39 = vadd.f32 %v75_v38, %v67_v35  ;;  %v81_v40 = vadd.f32 %v80_v36, %v75_v38  ;;  %v85_v41 = vadd.f32 %v84_v37, %v75_v38 }
  0xbd   :  { %v78_v42 = vmax.f32 %v77_v39, 0.0  ;;  %v82_v43 = vmax.f32 %v81_v40, 0.0  ;;  %v86_v44 = vmax.f32 %v85_v41, 0.0 }
  0xbf   :  { %v79_v45 = vmin.f32 %v78_v42, 1.0  ;;  %v83_v46 = vmin.f32 %v82_v43, 1.0  ;;  %v87_v47 = vmin.f32 %v86_v44, 1.0 }
  0xc1   :  { %v88_v48 = vmul.f32 0.2989, %v79_v45  ;;  %v89_v49 = vmul.f32 0.587, %v83_v46  ;;  %v91_v51 = vmul.f32 0.114, %v87_v47  ;;  %v96_v56 = vmul.f32 %v95_v53, %v79_v45 }
  0xc2   :  { %v100_v57 = vmul.f32 %v95_v53, %v83_v46  ;;  %v104_v58 = vmul.f32 %v95_v53, %v87_v47 }
  0xc3   :  { %v90_v50 = vadd.f32 %v89_v49, %v88_v48 }
  0xc5   :  { %v92_v54 = vadd.f32 %v91_v51, %v90_v50 }
  0xc7   :  { %v94_v55 = vmul.f32 %v93_v52, %v92_v54 }
  0xc9   :  { %v97_v59 = vadd.f32 %v96_v56, %v94_v55  ;;  %v101_v60 = vadd.f32 %v100_v57, %v94_v55  ;;  %v105_v61 = vadd.f32 %v104_v58, %v94_v55 }
  0xcb   :  { %v98_v62 = vmax.f32 %v97_v59, 0.0  ;;  %v102_v63 = vmax.f32 %v101_v60, 0.0  ;;  %v106_v0 = vmax.f32 %v105_v61, 0.0 }
  0xcd   :  { %v99_v1 = vmin.f32 %v98_v62, 1.0  ;;  %v103_v2 = vmin.f32 %v102_v63, 1.0  ;;  %v107_v3 = vmin.f32 %v106_v0, 1.0 }
  0xcf   :  { %v108_v4 = vmax.f32 %v99_v1, %v103_v2  ;;  %v110_v5 = vmin.f32 %v99_v1, %v103_v2 }
  0xd1   :  { %v290_v6 = vmax.f32 %v108_v4, %v107_v3  ;;  %v111_v7 = vmin.f32 %v110_v5, %v107_v3 }
  0xd3   :  { %v293_v8 = vsub.f32 %v290_v6, %v111_v7  ;;  %v121_v10 = vsub.f32 %v290_v6, %v99_v1  ;;  %v123_v11 = vsub.f32 %v290_v6, %v103_v2  ;;  %v125_v12 = vsub.f32 %v290_v6, %v107_v3 }
  0xd4   :  { %vm128_vm2 = vcmp.eq.f32.partialorder %v290_v6, %v103_v2  ;;  %vm127_vm3 = vcmp.eq.f32.partialorder %v290_v6, %v99_v1  ;;  %vm113_vm8 = vcmp.lt.f32.partialorder %v290_v6, 1e-20 }
  0xd5   :  { %vm116_vm1 = vcmp.lt.f32.partialorder %v293_v8, 1e-20  ;;  %v114_v41 = vsel %vm113_vm8, 1.0, %v290_v6 }
  0xd6   :  { %v117_v9 = vsel %vm116_vm1, 1.0, %v293_v8 }
  0xd7   :  { %242 = vrcp.f32 %v117_v9 }
  0xd8   :  { %244 = vrcp.f32 %v114_v41 }
  0xe1   :  { %v243_v13 = vpop.eup %242 }
  0xe2   :  { %v122_v14 = vmul.f32 %v243_v13, %v121_v10  ;;  %v124_v15 = vmul.f32 %v243_v13, %v123_v11  ;;  %v126_v16 = vmul.f32 %v243_v13, %v125_v12  ;;  %v245_v60 = vpop.eup %244 }
  0xe3   :  { %v119_v5 = vmul.f32 %v245_v60, %v293_v8 }
  0xe4   :  { %v129_v17 = vsub.f32 %v126_v16, %v124_v15  ;;  %v130_v18 = vadd.f32 2.0, %v122_v14  ;;  %v132_v19 = vadd.f32 4.0, %v124_v15 }
  0xe6   :  { %v131_v20 = vsub.f32 %v130_v18, %v126_v16  ;;  %v133_v21 = vsub.f32 %v132_v19, %v122_v14 }
  0xe8   :  { %v134_v22 = vsel %vm128_vm2, %v131_v20, %v133_v21 }
  0xe9   :  { %v135_v23 = vsel %vm127_vm3, %v129_v17, %v134_v22  ;;  %v120_v17 = vmin.f32 %v119_v5, 1.0 }
  0xea   :  { %v136_v24 = vmul.f32 0.16666667, %v135_v23 }
  0xeb   :  { %v156_v23 = vmul.f32 %v120_v17, %v290_v6 }
  0xec   :  { %v137_v26 = vadd.f32 1.0, %v136_v24 }
  0xee   :  { %v139_v27 = vadd.f32 %v138_v25, %v137_v26 }
  0xf0   :  { %v140_v28 = vand.u32 2147483647, %v139_v27  ;;  %v148_v33 = vand.u32 2147483648, %v139_v27 }
  0xf2   :  { %v143_v29 = vfloor.f32 %v140_v28 }
  0xf4   :  { %v144_v30 = vsub.f32 %v140_v28, %v143_v29 }
  0xf6   :  { %vm145_vm4 = vcmp.eq.f32.partialorder %v144_v30, 1.0 }
  0xf7   :  { %v146_v31 = vsel %vm145_vm4, 0.0, %v144_v30 }
  0xf8   :  { %v147_v32 = vand.u32 2147483647, %v146_v31 }
  0xfa   :  { %v149_v34 = vor.u32 %v148_v33, %v147_v32 }
  0xfc   :  { %vm150_vm5 = vcmp.ne.f32.partialorder %v149_v34, 0.0  ;;  %vm151_vm6 = vcmp.lt.f32.partialorder %v149_v34, 0.0  ;;  %v153_v35 = vadd.f32 1.0, %v149_v34 }
  0xfd   :  { %vm152_vm7 = vmand %vm151_vm6, %vm150_vm5 }
  0xfe   :  { %v154_v36 = vsel %vm152_vm7, %v153_v35, %v149_v34 }
  0xff   :  { %v155_v37 = vmul.f32 6.0, %v154_v36 }
 0x101   :  { %v157_v38 = vadd.f32 5.0, %v155_v37  ;;  %v181_v39 = vadd.f32 3.0, %v155_v37  ;;  %v205_v40 = vadd.f32 1.0, %v155_v37 }
 0x103   :  { %v158_v42 = vand.u32 2147483647, %v157_v38  ;;  %v182_v43 = vand.u32 2147483647, %v181_v39  ;;  %v206_v44 = vand.u32 2147483647, %v205_v40 }
 0x104   :  { %v167_v58 = vand.u32 2147483648, %v157_v38  ;;  %v191_v63 = vand.u32 2147483648, %v181_v39  ;;  %v215_v2 = vand.u32 2147483648, %v205_v40 }
 0x105   :  { %v160_v45 = vmul.f32 0.16666667, %v158_v42  ;;  %v184_v46 = vmul.f32 0.16666667, %v182_v43  ;;  %v208_v47 = vmul.f32 0.16666667, %v206_v44 }
 0x107   :  { %v161_v48 = vfloor.f32 %v160_v45  ;;  %v185_v49 = vfloor.f32 %v184_v46  ;;  %v209_v50 = vfloor.f32 %v208_v47 }
 0x109   :  { %v162_v51 = vmul.f32 6.0, %v161_v48  ;;  %v186_v52 = vmul.f32 6.0, %v185_v49  ;;  %v210_v53 = vmul.f32 6.0, %v209_v50 }
 0x10b   :  { %v163_v54 = vsub.f32 %v158_v42, %v162_v51  ;;  %v187_v55 = vsub.f32 %v182_v43, %v186_v52  ;;  %v211_v56 = vsub.f32 %v206_v44, %v210_v53 }
 0x10d   :  { %vm164_vm9 = vcmp.eq.f32.partialorder %v163_v54, 6.0  ;;  %vm188_vm10 = vcmp.eq.f32.partialorder %v187_v55, 6.0  ;;  %vm212_vm11 = vcmp.eq.f32.partialorder %v211_v56, 6.0 }
 0x10e   :  { %v165_v57 = vsel %vm164_vm9, 0.0, %v163_v54  ;;  %v189_v59 = vsel %vm188_vm10, 0.0, %v187_v55  ;;  %v213_v0 = vsel %vm212_vm11, 0.0, %v211_v56 }
 0x10f   :  { %v166_v61 = vand.u32 2147483647, %v165_v57  ;;  %v190_v62 = vand.u32 2147483647, %v189_v59  ;;  %v214_v1 = vand.u32 2147483647, %v213_v0 }
 0x111   :  { %v168_v3 = vor.u32 %v167_v58, %v166_v61  ;;  %v192_v4 = vor.u32 %v191_v63, %v190_v62  ;;  %v216_v7 = vor.u32 %v215_v2, %v214_v1 }
 0x113   :  { %vm169_vm12 = vcmp.ne.f32.partialorder %v168_v3, 0.0  ;;  %vm170_vm13 = vcmp.lt.f32.partialorder %v168_v3, 0.0  ;;  %v172_v9 = vadd.f32 6.0, %v168_v3  ;;  %vm193_vm14 = vcmp.ne.f32.partialorder %v192_v4, 0.0 }
 0x114   :  { %vm171_vm15 = vmand %vm170_vm13, %vm169_vm12  ;;  %vm194_vm0 = vcmp.lt.f32.partialorder %v192_v4, 0.0  ;;  %v196_v10 = vadd.f32 6.0, %v192_v4  ;;  %vm217_vm1 = vcmp.ne.f32.partialorder %v216_v7, 0.0  ;;  %vm218_vm2 = vcmp.lt.f32.partialorder %v216_v7, 0.0 }
 0x115   :  { %v173_v11 = vsel %vm171_vm15, %v172_v9, %v168_v3  ;;  %vm195_vm3 = vmand %vm194_vm0, %vm193_vm14  ;;  %v220_v12 = vadd.f32 6.0, %v216_v7 }
 0x116   :  { %v174_v13 = vsub.f32 4.0, %v173_v11  ;;  %v197_v14 = vsel %vm195_vm3, %v196_v10, %v192_v4  ;;  %vm219_vm4 = vmand %vm218_vm2, %vm217_vm1 }
 0x117   :  { %v198_v15 = vsub.f32 4.0, %v197_v14  ;;  %v221_v16 = vsel %vm219_vm4, %v220_v12, %v216_v7 }
 0x118   :  { %v175_v8 = vmin.f32 %v173_v11, %v174_v13  ;;  %v222_v18 = vsub.f32 4.0, %v221_v16 }
 0x119   :  { %v199_v19 = vmin.f32 %v197_v14, %v198_v15 }
 0x11a   :  { %v176_v20 = vmax.f32 %v175_v8, 0.0  ;;  %v223_v21 = vmin.f32 %v221_v16, %v222_v18 }
 0x11b   :  { %v200_v22 = vmax.f32 %v199_v19, 0.0 }
 0x11c   :  { %v177_v24 = vmin.f32 %v176_v20, 1.0  ;;  %v224_v25 = vmax.f32 %v223_v21, 0.0 }
 0x11d   :  { %v201_v26 = vmin.f32 %v200_v22, 1.0 }
 0x11e   :  { %v178_v27 = vmul.f32 %v177_v24, %v156_v23  ;;  %v225_v28 = vmin.f32 %v224_v25, 1.0 }
 0x11f   :  { %v202_v29 = vmul.f32 %v201_v26, %v156_v23 }
 0x120   :  { %v179_v30 = vsub.f32 %v290_v6, %v178_v27  ;;  %v226_v31 = vmul.f32 %v225_v28, %v156_v23 }
 0x121   :  { %v203_v32 = vsub.f32 %v290_v6, %v202_v29 }
 0x122   :  { %180 = vst [vmem:[%s320_s2] sm:$0xf] %v179_v30  ;;  %v227_v33 = vsub.f32 %v290_v6, %v226_v31 }
 0x123   :  { %204 = vst [vmem:[%s320_s2 + $0x4] sm:$0xf] %v203_v32 }
 0x124   :  { %228 = vst [vmem:[%s320_s2 + $0x8] sm:$0xf] %v227_v33 }
 0x125   :  { %233 = vsyncpa [#allocation3], 1 }

</bundles_post_ra>
